<compile_context>
chip_gen: v6e
topology: v6e:2x2x1
jax: 0.10.0
libtpu: 0.0.40
codegen_flags: <defaults>
</compile_context>

<pallas_src>
import jax
import jax.numpy as jnp
from jax import lax
from jax.experimental import pallas as pl
from jax.experimental.pallas import tpu as pltpu


def _round_up(x: int, m: int) -> int:
    return ((x + m - 1) // m) * m


def _vmem_capacity_bytes() -> int:
    try:
        return int(pltpu.get_tpu_info().vmem_capacity_bytes)
    except Exception:
        return 64 << 20      # conservative (v7x-sized) fallback


# --------------------------------------------------------------------------- #
# Resident-table path: one-hot MXU gather (table lives in VMEM, fetched once). #
# --------------------------------------------------------------------------- #
def _make_onehot_kernel(tq: int, n_vocab_pad: int):
    def kernel(ids_ref, emb_ref, pos_ref, out_ref):
        # ids_ref : (tq, 1) int32 column of token ids for this tile
        # emb_ref : (n_vocab_pad, n_state) VMEM-resident table (constant block)
        # pos_ref : (tq, n_state) positional-embedding tile
        ids = ids_ref[...]                                             # (tq, 1)
        vocab_iota = lax.broadcasted_iota(jnp.int32, (tq, n_vocab_pad), 1)
        one_hot = (vocab_iota == ids).astype(emb_ref.dtype)            # (tq, V)
        # Single dense MXU matmul performs the whole gather for the tile.
        # (Note: depending on the MXU f32 precision mode this may carry
        #  bf16-level rounding; pass precision=HIGHEST if exactness is needed.)
        gathered = jnp.dot(one_hot, emb_ref[...],
                           preferred_element_type=jnp.float32)         # (tq, D)
        out_ref[0] = (gathered + pos_ref[...].astype(jnp.float32)
                      ).astype(out_ref.dtype)
    return kernel


# --------------------------------------------------------------------------- #
# HBM-gather path: per-row DMA gather, double-buffered across grid steps.     #
# --------------------------------------------------------------------------- #
def _make_hbm_gather_kernel(tq: int, s_pad: int, n_b: int, n_steps: int,
                            unroll: int):
    def kernel(ids_ref, emb_hbm, pos_ref, out_ref, gathered, sem):
        # ids_ref  : (B*s_pad,) int32 in SMEM (scalar prefetch)
        # emb_hbm  : (n_vocab, n_state) table left in HBM (memory_space=ANY)
        # gathered : (2, tq, n_state) VMEM double buffer
        # sem      : (2,) DMA semaphores (one per buffer slot)
        j = pl.program_id(0)
        b = pl.program_id(1)
        step = j * n_b + b
        cur = step % 2
        nxt = 1 - cur

        def issue_tile(jj, bb, slot):
            base = bb * s_pad + jj * tq
            def body(r, carry):
                tok = ids_ref[base + r]
                pltpu.make_async_copy(emb_hbm.at[tok], gathered.at[slot, r],
                                      sem.at[slot]).start()
                return carry
            lax.fori_loop(0, tq, body, 0, unroll=unroll)

        # Prime: the very first grid step issues its own gather.
        @pl.when(step == 0)
        def _prime():
            issue_tile(j, b, cur)

        # Prefetch: issue next step's row gathers before waiting on this one,
        # so the DMA engine works while we wait / add / store.
        if n_steps > 1:
            @pl.when(step + 1 < n_steps)
            def _prefetch_next():
                nstep = step + 1
                issue_tile(nstep // n_b, nstep % n_b, nxt)

        # Wait on this tile's row copies (exact per-row descriptors).
        base = b * s_pad + j * tq
        def wait_body(r, carry):
            tok = ids_ref[base + r]
            pltpu.make_async_copy(emb_hbm.at[tok], gathered.at[cur, r],
                                  sem.at[cur]).wait()
            return carry
        lax.fori_loop(0, tq, wait_body, 0, unroll=unroll)

        # One dense (tq, n_state) add + store (sublane/lane-dense slab).
        out_ref[0] = (gathered[cur].astype(jnp.float32)
                      + pos_ref[...].astype(jnp.float32)).astype(out_ref.dtype)
    return kernel


# --------------------------------------------------------------------------- #
# Wrapper                                                                      #
# --------------------------------------------------------------------------- #
def logits_inference_firstly_embedding(
    token_ids,
    token_embedding,
    positional_embedding,
    *,
    out_dtype=None,          # e.g. jnp.bfloat16 to halve the HBM write stream
    tq_max=1024,             # tokens per grid step (rounded to a multiple of 8)
    table_in_vmem=None,      # None -> auto (fits VMEM & vocab small enough)
    onehot_vocab_max=8192,   # largest (padded) vocab allowed on the MXU path
    dma_unroll=8,
):
    """token_embedding(x) + positional_embedding via Pallas TPU."""
    B, S = token_ids.shape
    n_vocab, n_state = token_embedding.shape
    assert positional_embedding.shape == (S, n_state)

    emb_dtype = token_embedding.dtype
    if out_dtype is None:
        out_dtype = emb_dtype

    # ---- tiling along the sequence axis -------------------------------------
    tq_max = max(8, _round_up(int(tq_max), 8))
    tq = _round_up(S, 8) if S <= tq_max else tq_max
    s_pad = _round_up(S, tq)
    n_s_tiles = s_pad // tq

    # ---- prepare inputs (clamp ids, pad S) -----------------------------------
    # TODO(synk): PyTorch nn.Embedding raises on out-of-range ids; here they are
    # clamped.  Padded tail rows (s_pad > S) gather id 0 and are sliced off.
    ids = jnp.clip(token_ids.astype(jnp.int32), 0, n_vocab - 1)
    pos = positional_embedding
    if s_pad != S:
        ids = jnp.pad(ids, ((0, 0), (0, s_pad - S)))
        pos = jnp.pad(pos, ((0, s_pad - S), (0, 0)))

    emb_itemsize = jnp.dtype(emb_dtype).itemsize
    pos_itemsize = jnp.dtype(pos.dtype).itemsize
    out_itemsize = jnp.dtype(out_dtype).itemsize
    n_vocab_pad = _round_up(n_vocab, 128)          # MXU/lane-friendly vocab pad

    # ---- generation-aware VMEM budgeting -------------------------------------
    vmem_cap = _vmem_capacity_bytes()              # 128 MiB v5e/v6e, 64 MiB v7x
    vmem_budget = max(vmem_cap - (16 << 20), 32 << 20)   # Mosaic headroom

    tile_elems = tq * n_state
    pipeline_tiles = 2 * tile_elems * (pos_itemsize + out_itemsize)
    resident_need = (pipeline_tiles
                     + 2 * tq * 128 * 4                       # ids column tiles
                     + 2 * n_vocab_pad * n_state * emb_itemsize   # resident table
                     + tq * n_vocab_pad * (4 + emb_itemsize))     # one-hot scratch
    hbm_need = pipeline_tiles + 2 * tile_elems * emb_itemsize     # gather dbl-buf

    resident_fits = resident_need + (8 << 20) <= vmem_budget
    if table_in_vmem is None:
        table_in_vmem = resident_fits and (n_vocab_pad <= onehot_vocab_max)
    elif table_in_vmem and not resident_fits:
        table_in_vmem = False          # graceful fallback instead of VMEM OOM

    # ---- build the pallas_call ------------------------------------------------
    if table_in_vmem:
        emb_pad = token_embedding
        if n_vocab_pad != n_vocab:
            emb_pad = jnp.pad(token_embedding,
                              ((0, n_vocab_pad - n_vocab), (0, 0)))
        ids_col = ids.reshape(B * s_pad, 1)        # (tq, 1) blocks per tile

        kernel = _make_onehot_kernel(tq, n_vocab_pad)
        grid_spec = pltpu.PrefetchScalarGridSpec(
            num_scalar_prefetch=0,
            grid=(n_s_tiles, B),                   # b innermost: pos reused
            in_specs=[
                pl.BlockSpec((tq, 1), lambda j, b: (b * n_s_tiles + j, 0)),
                pl.BlockSpec((n_vocab_pad, n_state), lambda j, b: (0, 0)),
                pl.BlockSpec((tq, n_state), lambda j, b: (j, 0)),
            ],
            out_specs=pl.BlockSpec((1, tq, n_state), lambda j, b: (b, j, 0)),
        )
        operands = (ids_col, emb_pad, pos)
        semantics = ("parallel", "parallel")       # no cross-step state
        vmem_need = resident_need
    else:
        ids_flat = ids.reshape(B * s_pad)          # 1-D SMEM scalar prefetch
        n_steps = n_s_tiles * B
        unroll = int(max(1, min(dma_unroll, tq)))

        kernel = _make_hbm_gather_kernel(tq, s_pad, B, n_steps, unroll)
        grid_spec = pltpu.PrefetchScalarGridSpec(
            num_scalar_prefetch=1,
            grid=(n_s_tiles, B),
            in_specs=[
                pl.BlockSpec(memory_space=pl.ANY),                 # table in HBM
                pl.BlockSpec((tq, n_state), lambda j, b, ids_s: (j, 0)),
            ],
            out_specs=pl.BlockSpec((1, tq, n_state),
                                   lambda j, b, ids_s: (b, j, 0)),
            scratch_shapes=[
                pltpu.VMEM((2, tq, n_state), emb_dtype),
                pltpu.SemaphoreType.DMA((2,)),
            ],
        )
        operands = (ids_flat, token_embedding, pos)
        # Cross-grid-step DMA pipelining carries state between steps, so keep
        # the grid sequential (safe on megacore parts).
        semantics = ("arbitrary", "arbitrary")
        vmem_need = hbm_need

    vmem_limit = int(min(vmem_need + (8 << 20), vmem_cap))

    out = pl.pallas_call(
        kernel,
        grid_spec=grid_spec,
        out_shape=jax.ShapeDtypeStruct((B, s_pad, n_state), out_dtype),
        compiler_params=pltpu.CompilerParams(
            dimension_semantics=semantics,
            vmem_limit_bytes=vmem_limit,
        ),
    )(*operands)

    if s_pad != S:
        out = out[:, :S, :]
    return out


if __name__ == "__main__":
    B, S = 2, 16
    n_vocab, n_state = 64, 128

    key = jax.random.PRNGKey(0)
    k_emb, k_pos, k_ids = jax.random.split(key, 3)

    token_embedding = jax.random.normal(k_emb, (n_vocab, n_state), dtype=jnp.float32)
    positional_embedding = jax.random.normal(k_pos, (S, n_state), dtype=jnp.float32)
    token_ids = jax.random.randint(k_ids, (B, S), 0, n_vocab, dtype=jnp.int32)

    ref = token_embedding[token_ids] + positional_embedding[None, :, :]

    # Path 1: resident table + one-hot MXU gather (auto-selected: small vocab).
    out_fast = jax.block_until_ready(
        logits_inference_firstly_embedding(
            token_ids, token_embedding, positional_embedding))
    assert out_fast.shape == (B, S, n_state)
    # MXU f32 matmul may carry bf16-level rounding depending on precision mode.
    assert jnp.allclose(out_fast, ref, atol=1e-2, rtol=1e-2), \
        "resident/one-hot path mismatch vs reference"

    # Path 2: HBM table + double-buffered per-row DMA gather (forced; small tq
    # so the cross-step pipelining runs over several grid steps). Exact path.
    out_dma = jax.block_until_ready(
        logits_inference_firstly_embedding(
            token_ids, token_embedding, positional_embedding,
            table_in_vmem=False, tq_max=8))
    assert jnp.allclose(out_dma, ref, atol=1e-6), \
        "HBM DMA path mismatch vs reference"

    # Path 3: non-multiple-of-8 sequence length exercises the padding logic.
    S2, B2 = 5, 3
    pos2 = jax.random.normal(k_pos, (S2, n_state), dtype=jnp.float32)
    ids2 = jax.random.randint(k_ids, (B2, S2), 0, n_vocab, dtype=jnp.int32)
    ref2 = token_embedding[ids2] + pos2[None, :, :]
    out2 = jax.block_until_ready(
        logits_inference_firstly_embedding(ids2, token_embedding, pos2))
    assert out2.shape == (B2, S2, n_state)
    assert jnp.allclose(out2, ref2, atol=1e-2, rtol=1e-2), \
        "padded path mismatch vs reference"

    print("KERNEL_OK")
</pallas_src>

<mosaic_0001>
module attributes {stable_mosaic.version = 11 : i64} {
  func.func @kernel(%arg0: i32, %arg1: i32, %arg2: memref<16x1xi32, #tpu.memory_space<vmem>>, %arg3: memref<128x128xf32, #tpu.memory_space<vmem>>, %arg4: memref<16x128xf32, #tpu.memory_space<vmem>>, %arg5: memref<1x16x128xf32, #tpu.memory_space<vmem>>) attributes {dimension_semantics = [#tpu.dimension_semantics<parallel>, #tpu.dimension_semantics<parallel>], iteration_bounds = array<i64: 1, 2>, scalar_prefetch = 0 : i64, scratch_operands = 0 : i64, tpu.core_type = #tpu.core_type<tc>, window_params = [{transform_indices = @transform_0, window_bounds = array<i64: 16, 1>}, {pipeline_mode = #tpu.pipeline_mode<synchronous>, transform_indices = @transform_1, window_bounds = array<i64: 128, 128>}, {transform_indices = @transform_2, window_bounds = array<i64: 16, 128>}, {transform_indices = @transform_3, window_bounds = array<i64: 1, 16, 128>}]} {
    %c0 = arith.constant 0 : index
    %c0_0 = arith.constant 0 : index
    %0 = vector.load %arg2[%c0, %c0_0] : memref<16x1xi32, #tpu.memory_space<vmem>>, vector<16x1xi32>
    %1 = tpu.iota {dimensions = array<i32: 1>} : vector<16x128xi32>
    %2 = vector.broadcast %0 : vector<16x1xi32> to vector<16x128xi32>
    %3 = arith.cmpi eq, %1, %2 : vector<16x128xi32>
    %4 = arith.extui %3 : vector<16x128xi1> to vector<16x128xi32>
    %5 = arith.sitofp %4 : vector<16x128xi32> to vector<16x128xf32>
    %c0_1 = arith.constant 0 : index
    %c0_2 = arith.constant 0 : index
    %6 = vector.load %arg3[%c0_1, %c0_2] : memref<128x128xf32, #tpu.memory_space<vmem>>, vector<128x128xf32>
    %cst = arith.constant dense<0.000000e+00> : vector<16x128xf32>
    %7 = tpu.matmul %5, %6, %cst {dimension_numbers = #tpu.dot_dimension_numbers<[1], [0], [0], [1], [0, 0, 1, 1], [], []>} : vector<16x128xf32>, vector<128x128xf32>, vector<16x128xf32> -> vector<16x128xf32>
    %c0_3 = arith.constant 0 : index
    %c0_4 = arith.constant 0 : index
    %8 = vector.load %arg4[%c0_3, %c0_4] : memref<16x128xf32, #tpu.memory_space<vmem>>, vector<16x128xf32>
    %9 = arith.addf %7, %8 : vector<16x128xf32>
    %c0_5 = arith.constant 0 : index
    %c0_6 = arith.constant 0 : index
    %c0_7 = arith.constant 0 : index
    %10 = vector.load %arg5[%c0_5, %c0_6, %c0_7] : memref<1x16x128xf32, #tpu.memory_space<vmem>>, vector<1x16x128xf32>
    %11 = vector.shape_cast %10 : vector<1x16x128xf32> to vector<16x128xf32>
    %12 = vector.shape_cast %9 : vector<16x128xf32> to vector<1x16x128xf32>
    tpu.vector_store %arg5[%c0_5, %c0_6, %c0_7], %12 {strides = array<i32>} : memref<1x16x128xf32, #tpu.memory_space<vmem>>, vector<1x16x128xf32>,
    return
  }
  func.func @transform_0(%arg0: i32, %arg1: i32) -> (i32, i32) {
    %c1_i32 = arith.constant 1 : i32
    %0 = arith.muli %arg1, %c1_i32 : i32
    %1 = arith.addi %0, %arg0 : i32
    %c0_i32 = arith.constant 0 : i32
    %c0_i32_0 = arith.constant 0 : i32
    return %1, %c0_i32 : i32, i32
  }
  func.func @transform_1(%arg0: i32, %arg1: i32) -> (i32, i32) {
    %c0_i32 = arith.constant 0 : i32
    %c0_i32_0 = arith.constant 0 : i32
    %c0_i32_1 = arith.constant 0 : i32
    return %c0_i32, %c0_i32_0 : i32, i32
  }
  func.func @transform_2(%arg0: i32, %arg1: i32) -> (i32, i32) {
    %c0_i32 = arith.constant 0 : i32
    %c0_i32_0 = arith.constant 0 : i32
    return %arg0, %c0_i32 : i32, i32
  }
  func.func @transform_3(%arg0: i32, %arg1: i32) -> (i32, i32, i32) {
    %c0_i32 = arith.constant 0 : i32
    %c0_i32_0 = arith.constant 0 : i32
    return %arg1, %arg0, %c0_i32 : i32, i32, i32
  }
}

</mosaic_0001>

<bundles_post_ra>
// kernel: tpu_custom_call.1
= control target key start
LH: loop header
LB: loop body
LE: loop exit
PB: predicated region body
PF: predicated region fallthrough
CT: control target
= control target key end

     0   :  { %8 = vsyncpa [#allocation3], 0  ;;  %s880_s0 = inlined_call_operand.vmem [shape: s32[32,1], index: 0, kind: input, shape index: {}]   ;;  %s881_s1 = inlined_call_operand.hbm [shape: f32[128,128], index: 1, kind: input, shape index: {}]   ;;  %s882_s2 = inlined_call_operand.vmem [shape: f32[16,128], index: 2, kind: input, shape index: {}]   ;;  %s883_s3 = inlined_call_operand.hbm [shape: f32[2,16,128], index: 3, kind: output, shape index: {}]  }
   0x1   :  { %9 = vsyncpa [#allocation4], 0 }
   0x2   :  { %11 = vsyncpa [#allocation4 + $0x1], 0  ;;  %s740_s12 = smov 0   ;;  %s742_s13 = smov 0  }
   0x3   :  { %s744_s14 = smov 0   ;;  %s746_s15 = smov 0  }
   0x4   :  { %s748_s16 = smov 0   ;;  %s750_s17 = smov 0  }
   0x5 LB: > { %s457_s18 = sadd.s32 4294967295, %s710_s17   ;;  %s458_s19 = sadd.s32 4294967294, %s710_s17   ;;  %s710_s17 = sphi %s750_s17, %s17_s17   ;;  %s706_s16 = sphi %s748_s16, %s892_s16   ;;  %s702_s15 = sphi %s746_s15, %s891_s15   ;;  %s698_s14 = sphi %s744_s14, %s890_s14   ;;  %s694_s13 = sphi %s742_s13, %s889_s13   ;;  %s690_s12 = sphi %s740_s12, %s888_s12  }
   0x6   : > { %s26_s20 = sadd.s32 1, %s706_s16  ;;  %s113_s21 = sadd.s32 1, %s698_s14 }
   0x7   : > { %p27_p0 = scmp.ge.s32.totalorder %s26_s20, 2  ;;  %p123_p1 = scmp.ne.s32.totalorder %s698_s14, %s694_s13 }
   0x8   : > { %p124_p2 = scmp.eq.s32.totalorder %s457_s18, 1  ;;  %p129_p3 = scmp.ne.s32.totalorder %s694_s13, %s690_s12 }
   0x9   : > { %s894_s20 = smov (%p27_p0, %s26_s20), 0  ;;  %p130_p5 = scmp.eq.s32.totalorder %s458_s19, 1 }
   0xa   : > { %p780_p4 = por %p124_p2, %p123_p1  ;;  %s108_s23 = ssub.s32 %s706_s16, %s894_s20 }
   0xb   : > { %p459_p6 = scmp.ge.s32.totalorder %s710_s17, 1  ;;  %p111_p7 = scmp.eq.s32.totalorder %s108_s23, 0 }
   0xc   : > { %p787_p8 = por %p130_p5, %p129_p3  ;;  %p137_p9 = scmp.lt.s32.totalorder %s710_s17, 3 }
   0xd   : > { %s793_s25 = scalar_select %p111_p7, %s698_s14, %s113_s21  }
   0xe   : > { %p795_p10 = pnand %p459_p6, %p137_p9  ;;  %p799_p11 = scmp.eq.s32.totalorder %s457_s18, 0 }
   0xf   : > { %s712_s28 = smov [#allocation2]  }
  0x10   : > { %p537_p12 = pneg %p795_p10  ;;  %s149_s29 = sshll.u32 %s712_s28, 4  ;;  %s150_s29 = int_to_ptr.vmem [resolvable:$true] %s149_s29 }
  0x11   : > { %s615_s30 = scalar_lea.vmem %s150_s29, 2048  ;;  %p623_p5 = scmp.lt.s32.totalorder %s150_s29, %s150_s29 }
  0x12   : > { %p538_p13 = pnand %p799_p11, %p537_p12  ;;  %p616_p1 = scmp.ne.s32.totalorder %s150_s29, %s615_s30 }
  0x13   : > { %p624_p6 = scmp.lt.s32.totalorder %s615_s30, %s615_s30 }
  0x14   : > { %p606_p0 = pneg %p538_p13 }
  0x15   : > { %p625_p7 = por %p624_p6, %p623_p5 }
  0x16   : > { %p618_p2 = pnand %p616_p1, %p606_p0 }
  0x18   : > { %p619_p3 = pneg %p618_p2 }
  0x1a   : > { %p626_p9 = pnand %p625_p7, %p619_p3 }
  0x1c   : > { %629 = shalt.err (!%p626_p9)
}
  0x1d   : > { %s713_s4 = smov 128   ;;  %s714_s5 = smov 8  }
  0x1e   : > { %540 = dma.hbm_to_vmem [thread:$0]  (!%p538_p13), %s881_s1, 2048, %s150_s29, [#allocation3], %s713_s4, %s713_s4, %s714_s5  }
  0x1f   : > { %185 = sbr.rel (%p795_p10) target bundleno = 384 (0x180), region = 32 }
  0x24   : > { %681 = dma.done.wait (%p799_p11), [#allocation3], 2048  }
  0x25   : > { %683 = vsyncadd (%p799_p11), [#allocation3], 4294965248  ;;  %s466_s8 = sshll.u32 %s702_s15, 1  ;;  %v715_v0 = vmov 0   ;;  %v261_v2 = vld [vmem:[#allocation2 + $0x78] sm:$0xff]  ;;  %v260_v3 = vld [vmem:[#allocation2 + $0x70] sm:$0xff]  ;;  %v232_v19 = vlaneseq }
  0x26   : > { %603 = vset.pattern.permute.xlu0 %v715_v0  ;;  %p217_p12 = scmp.lt.s32.totalorder %s466_s8, 3  ;;  %496 = vmatprep.subr.mxu0 %v261_v2  ;;  %v259_v5 = vld [vmem:[#allocation2 + $0x68] sm:$0xff]  ;;  %v258_v6 = vld [vmem:[#allocation2 + $0x60] sm:$0xff]  ;;  %v257_v7 = vld [vmem:[#allocation2 + $0x58] sm:$0xff]  ;;  %v716_v22 = vmov 1.0   ;;  %s212_s19 = sand.u32 1, %s694_s13  }
  0x27   : > { %497 = vmatpush3.msra.mxu0 %v261_v2  ;;  %v256_v8 = vld [vmem:[#allocation2 + $0x50] sm:$0xff]  ;;  %v255_v9 = vld [vmem:[#allocation2 + $0x48] sm:$0xff]  ;;  %v254_v10 = vld [vmem:[#allocation2 + $0x40] sm:$0xff]  ;;  %v233_v20 = vand.u32 127, %v232_v19  ;;  %s465_s21 = sshll.u32 %s212_s19, 4  ;;  %s477_s29 = sshll.u32 %s702_s15, 8 }
  0x28   : > { %s896_s8 = smov (!%p217_p12, %s466_s8), 3  ;;  %498 = vmatprep.subr.mxu0 %v260_v3  ;;  %v253_v11 = vld [vmem:[#allocation2 + $0x38] sm:$0xff]  ;;  %v252_v12 = vld [vmem:[#allocation2 + $0x30] sm:$0xff]  ;;  %v251_v13 = vld [vmem:[#allocation2 + $0x28] sm:$0xff]  ;;  %s214_s27 = scalar_lea.vmem [#allocation5], %s465_s21 }
  0x29   : > { %s467_s9 = sshll.u32 %s896_s8, 3  ;;  %499 = vmatpush3.msra.mxu0 %v260_v3  ;;  %v250_v14 = vld [vmem:[#allocation2 + $0x20] sm:$0xff]  ;;  %v249_v15 = vld [vmem:[#allocation2 + $0x18] sm:$0xff]  ;;  %v248_v16 = vld [vmem:[#allocation2 + $0x10] sm:$0xff]  ;;  %s357_s28 = sshll.u32 %s214_s27, 4  ;;  %s828_s28 = int_to_ptr.vmem [resolvable:$true] %s357_s28 }
  0x2a   : > { %s220_s18 = scalar_lea.vmem %s880_s0, %s467_s9  ;;  %500 = vmatprep.subr.mxu0 %v259_v5  ;;  %v247_v17 = vld [vmem:[#allocation2 + $0x8] sm:$0xff]  ;;  %v246_v18 = vld [vmem:[#allocation2] sm:$0xff]  ;;  %s833_s7 = scalar_lea.hbm %s883_s3, %s477_s29 }
  0x2b   : > { %v230_v1 = vld [vmem:[%s220_s18] sm:$0xff]  ;;  %v231_v4 = vld [vmem:[%s220_s18 + $0x8] sm:$0xff]  ;;  %501 = vmatpush3.msra.mxu0 %v259_v5  ;;  %s835_s15 = scalar_lea.sflag [#allocation4], %s212_s19  ;;  %s630_s8 = scalar_lea.vmem %s828_s28, 256 }
  0x2c   : > { %235 = vperm.xlu0 %603, %v230_v1   ;;  %502 = vmatprep.subr.mxu0 %v258_v6  ;;  %v263_v24 = vld [vmem:[%s882_s2 + $0x8] sm:$0xff]  ;;  %v262_v26 = vld [vmem:[%s882_s2] sm:$0xff]  ;;  %p631_p10 = scmp.ne.s32.totalorder %s828_s28, %s630_s8  ;;  %s717_s9 = smov [#allocation5]  }
  0x2d   : > { %503 = vmatpush3.msra.mxu0 %v258_v6  ;;  %s634_s10 = sshll.u32 %s717_s9, 4  ;;  %s635_s10 = int_to_ptr.vmem [resolvable:$false] %s634_s10 }
  0x2e   : > { %504 = vmatprep.subr.mxu0 %v257_v7  ;;  %p632_p11 = pnand %p631_p10, %p780_p4  ;;  %s636_s11 = scalar_lea.vmem %s635_s10, 512 }
  0x2f   : > { %505 = vmatpush3.msra.mxu0 %v257_v7  ;;  %p637_p0 = scmp.lt.s32.totalorder %s828_s28, %s635_s10  ;;  %p638_p1 = scmp.lt.s32.totalorder %s636_s11, %s630_s8 }
  0x30   : > { %238 = vperm.xlu0 %603, %v231_v4   ;;  %506 = vmatprep.subr.mxu0 %v256_v8  ;;  %p633_p13 = pneg %p632_p11 }
  0x31   : > { %507 = vmatpush3.msra.mxu0 %v256_v8  ;;  %p639_p2 = por %p638_p1, %p637_p0 }
  0x32   : > { %508 = vmatprep.subr.mxu0 %v255_v9 }
  0x33   : > { %509 = vmatpush3.msra.mxu0 %v255_v9  ;;  %p640_p3 = pnand %p639_p2, %p633_p13 }
  0x34   : > { %510 = vmatprep.subr.mxu0 %v254_v10 }
  0x35   : > { %511 = vmatpush3.msra.mxu0 %v254_v10 }
  0x36   : > { %512 = vmatprep.subr.mxu0 %v253_v11 }
  0x37   : > { %513 = vmatpush3.msra.mxu0 %v253_v11 }
  0x38   : > { %514 = vmatprep.subr.mxu0 %v252_v12 }
  0x39   : > { %515 = vmatpush3.msra.mxu0 %v252_v12 }
  0x3a   : > { %516 = vmatprep.subr.mxu0 %v251_v13 }
  0x3b   : > { %517 = vmatpush3.msra.mxu0 %v251_v13 }
  0x3c   : > { %518 = vmatprep.subr.mxu0 %v250_v14 }
  0x3d   : > { %519 = vmatpush3.msra.mxu0 %v250_v14 }
  0x3e   : > { %520 = vmatprep.subr.mxu0 %v249_v15 }
  0x3f   : > { %521 = vmatpush3.msra.mxu0 %v249_v15 }
  0x40   : > { %522 = vmatprep.subr.mxu0 %v248_v16 }
  0x41   : > { %523 = vmatpush3.msra.mxu0 %v248_v16 }
  0x42   : > { %524 = vmatprep.subr.mxu0 %v247_v17 }
  0x43   : > { %525 = vmatpush3.msra.mxu0 %v247_v17 }
  0x44   : > { %526 = vmatprep.subr.mxu0 %v246_v18 }
  0x45   : > { %527 = vmatpush3.msra.mxu0 %v246_v18 }
  0xa7   : > { %v236_v21 = vpop.permute.xlu0 %235 }
  0xa8   : > { %vm240_vm0 = vcmp.eq.s32.totalorder %v233_v20, %v236_v21 }
  0xa9   : > { %528 = vmatprep.mubr.msk.f32.mxu0 %vm240_vm0, %v716_v22 }
  0xab   : > { %v239_v23 = vpop.permute.xlu0 %238 }
  0xac   : > { %vm241_vm1 = vcmp.eq.s32.totalorder %v233_v20, %v239_v23 }
  0xad   : > { %529 = vmatmul.mubr.msk.f32.vlgmr.msra.gmra.mxu0 %vm241_vm1, %v716_v22 }
 0x16d   : > { %v530_v25 = vpop.f32.mrf.mxu0 }
 0x16e   : > { %v336_v27 = vadd.f32 %v530_v25, %v263_v24 }
 0x16f   : > { %v330_v28 = vpop.f32.mrf.mxu0 }
 0x170   : > { %340 = vst [vmem:[%s214_s27 + $0x8] sm:$0xff] %v336_v27  ;;  %v331_v29 = vadd.f32 %v330_v28, %v262_v26 }
 0x172   : > { %339 = vst [vmem:[%s214_s27] sm:$0xff] %v331_v29 }
 0x173   : > { %643 = shalt.err (!%p640_p3)
}
 0x174   : > { %s644_s18 = scalar_lea.hbm %s833_s7, 256  ;;  %s648_s23 = scalar_lea.hbm %s883_s3, 512 }
 0x175   : > { %p645_p5 = scmp.ne.s32.totalorder %s833_s7, %s644_s18  ;;  %p649_p9 = scmp.lt.s32.totalorder %s833_s7, %s883_s3 }
 0x176   : > { %p650_p12 = scmp.lt.s32.totalorder %s648_s23, %s644_s18 }
 0x177   : > { %p646_p6 = pnand %p645_p5, %p780_p4 }
 0x178   : > { %p651_p10 = por %p650_p12, %p649_p9 }
 0x179   : > { %p647_p7 = pneg %p646_p6 }
 0x17b   : > { %p652_p11 = pnand %p651_p10, %p647_p7 }
 0x17d   : > { %655 = shalt.err (!%p652_p11)
}
 0x17e   : > { %s718_s29 = smov 128   ;;  %s719_s30 = smov 8  }
 0x17f   : > { %535 = dma.vmem_to_hbm [thread:$0]  (%p780_p4), %s828_s28, 256, %s833_s7, %s835_s15, %s718_s29, %s718_s29, %s719_s30  }
 0x180 PF: > { %p547_p13 = scmp.ge.s32.totalorder %s710_s17, 2  ;;  %s372_s4 = sand.u32 1, %s690_s12  }
 0x181   : > { %s373_s5 = scalar_lea.sflag [#allocation4], %s372_s4 }
 0x182   : > { %p542_p0 = pnand %p547_p13, %p787_p8 }
 0x184   : > { %p543_p1 = pneg %p542_p0 }
 0x186   : > { %685 = dma.done.wait (%p543_p1), %s373_s5, 256  }
 0x187   : > { %687 = vsyncadd (%p543_p1), %s373_s5, 4294967040  ;;  %s17_s17 = sadd.s32 1, %s710_s17   ;;  %s888_s12 = smov %s694_s13 }
 0x188   : > { %p14_p2 = scmp.ge.s32.totalorder %s17_s17, 4   ;;  %s889_s13 = smov %s698_s14 }
 0x189   : > { %s890_s14 = smov %s793_s25  ;;  %s891_s15 = smov %s706_s16 }
 0x18a   : > { %s892_s16 = smov %s894_s20  ;;  %16 = sbr.rel (!%p14_p2) target bundleno = 5 (0x5), region = 75 }
 0x18f   :  { %378 = vsyncpa [#allocation3], 1 }
 0x190   :  { %380 = vsyncpa [#allocation3 + $0x1], 1 }
 0x191   :  { %381 = vsyncpa [#allocation4], 1 }
 0x192   :  { %383 = vsyncpa [#allocation4 + $0x1], 1 }

</bundles_post_ra>
